<compile_context>
chip_gen: v7x
topology: tpu7x:2x2x1
jax: 0.10.0
libtpu: 0.0.40
codegen_flags: <defaults>
</compile_context>

<pallas_src>
import jax
import jax.numpy as jnp
from jax.experimental import pallas as pl
from jax.experimental.pallas import tpu as pltpu


def _gru_model_kernel(x_ref, adj_ref, wproj_ref, w2_ref,
                      wx_ref, wh_ref, b_ref,
                      h_out_ref, a_out_ref):
    f32 = jnp.float32
    T, N, F = x_ref.shape
    Hd = w2_ref.shape[0]
    H2 = 2 * Hd

    # ------------- time-independent, T-batched front half (off the serial path)
    # TODO(synk): AGTG_Model was not provided with the module; stand-in is a
    # Graph-WaveNet style adaptive adjacency softmax(relu((x Wa1)(x Wa2)^T + adj)).
    x = x_ref[...]                                        # (T, N, F)
    x2 = x.reshape(T * N, F)

    # One fused projection: wproj = [Wa1 @ Wa2^T | W1]  (F, F+Hd)
    proj = jnp.dot(x2, wproj_ref[...], preferred_element_type=f32)   # (T*N, F+Hd)
    xm = proj[:, :F].reshape(T, N, F)                     # x_t @ (Wa1 Wa2^T)
    xw1 = proj[:, F:].reshape(T, N, Hd)                   # x_t @ W1

    # Adaptive adjacency; softmax denominator divide on the (otherwise idle) EUP.
    logits = jnp.einsum('tnf,tmf->tnm', xm, x, preferred_element_type=f32)
    logits = jnp.maximum(logits + adj_ref[...], 0.0)      # broadcast adj over t
    mrow = jnp.max(logits, axis=-1, keepdims=True)
    p = jnp.exp(logits - mrow)
    denom = jnp.sum(p, axis=-1, keepdims=True)
    a = p * pl.reciprocal(denom, approx=True)             # (T, N, N)
    a_out_ref[...] = a[T - 1]                             # last adaptive adjacency

    # 2-layer GCN, batched over t (dropout in eval mode == identity).
    h1 = jnp.maximum(
        jnp.einsum('tnm,tmh->tnh', a, xw1, preferred_element_type=f32), 0.0)
    h1w2 = jnp.dot(h1.reshape(T * N, Hd), w2_ref[...],
                   preferred_element_type=f32).reshape(T, N, Hd)
    h2 = jnp.maximum(
        jnp.einsum('tnm,tmh->tnh', a, h1w2, preferred_element_type=f32), 0.0)

    # Hoisted x-side GRU gate matmuls: lay g_t = [h1_t | h2_t] for all t along
    # lanes -> one (3N, N) @ (N, T*2Hd) MXU push, biases folded in once.
    parts = []
    for t in range(T):
        parts.append(h1[t])
        parts.append(h2[t])
    G = jnp.concatenate(parts, axis=-1)                   # (N, T*2Hd) = (16, 128)
    px = jnp.dot(wx_ref[...], G, preferred_element_type=f32)         # (3N, T*2Hd)
    px = px + jnp.broadcast_to(b_ref[...], px.shape)      # [br;bu;bc] broadcast
    px_ru = px[:2 * N]                                    # r|u rows   (2N, T*2Hd)
    px_c = px[2 * N:]                                     # cand rows  (N,  T*2Hd)

    wh = wh_ref[...]                                      # [Wr_h;Wu_h;Wc_h] (3N,N)
    wh_ru = wh[:2 * N]                                    # stacked r/u h-weights
    wc_h = wh[2 * N:]                                     # Wc_h

    # ------------- serial GRU recurrence: 2 MXU + 2 EUP per step on the chain
    # T is small and static -> statically unrolled Python loop (static lane
    # slices, full scheduler visibility).
    # TODO(synk): if T is ever scaled up, cap the unroll / move px to a VMEM
    # scratch indexed by a fori_loop counter to avoid vreg spills.
    h = jnp.zeros((N, H2), f32)
    for t in range(T):
        sl = slice(t * H2, (t + 1) * H2)
        if t == 0:
            # H_0 == 0 exactly: Wr_h@h = Wu_h@h = Wc_h@(r*h) = 0 -> skip the dots.
            ru = jax.nn.sigmoid(px_ru[:, sl])
            u = ru[N:]
            h = (1.0 - u) * jnp.tanh(px_c[:, sl])
        else:
            ru = jax.nn.sigmoid(
                jnp.dot(wh_ru, h, preferred_element_type=f32) + px_ru[:, sl])
            r = ru[:N]
            u = ru[N:]
            c = jnp.tanh(
                jnp.dot(wc_h, r * h, preferred_element_type=f32) + px_c[:, sl])
            h = u * h + (1.0 - u) * c
    h_out_ref[...] = h


def gru_model_forward(input_seq, adjacency_matrix, params):
    T, N, F = input_seq.shape
    Hd = params["W1"].shape[1]
    H2 = 2 * Hd
    hp = jax.lax.Precision.HIGHEST

    # Pack 15 tiny parameter operands into 5 dense ones (fewer tiny DMA
    # descriptors; enables the fused / stacked in-kernel matmuls).
    m = jnp.dot(params["Wa1"], params["Wa2"].T, precision=hp)         # fold once
    wproj = jnp.concatenate([m, params["W1"]], axis=1)                # (F, F+Hd)
    wx = jnp.concatenate(
        [params["Wr_x"], params["Wu_x"], params["Wc_x"]], axis=0)     # (3N, N)
    wh = jnp.concatenate(
        [params["Wr_h"], params["Wu_h"], params["Wc_h"]], axis=0)     # (3N, N)
    b = jnp.concatenate([params["br"], params["bu"], params["bc"]], axis=0)  # (3N,1)

    vmem = pl.BlockSpec(memory_space=pltpu.MemorySpace.VMEM)

    flops = (2 * T * N * F * (F + Hd)                # fused projection
             + 2 * T * N * N * F                     # adjacency logits
             + 2 * 2 * T * N * N * Hd                # two A @ (.) GCN contractions
             + 2 * T * N * Hd * Hd                   # h1 @ W2
             + 2 * 3 * N * N * T * H2                # hoisted x-side gate matmul
             + (T - 1) * (2 * 2 * N * N * H2         # fused r/u h-side dot
                          + 2 * N * N * H2))         # candidate h-side dot
    transcendentals = T * N * (N + 1) + T * 3 * N * H2
    bytes_accessed = 4 * (T * N * F + N * N + F * (F + Hd) + Hd * Hd
                          + 2 * 3 * N * N + 3 * N + N * H2 + N * N)

    h, a = pl.pallas_call(
        _gru_model_kernel,
        out_shape=(jax.ShapeDtypeStruct((N, H2), jnp.float32),
                   jax.ShapeDtypeStruct((N, N), jnp.float32)),
        in_specs=[vmem] * 7,
        out_specs=(vmem, vmem),
        cost_estimate=pl.CostEstimate(flops=flops,
                                      transcendentals=transcendentals,
                                      bytes_accessed=bytes_accessed),
    )(input_seq, adjacency_matrix, wproj, params["W2"], wx, wh, b)
    return h, a


# ---------------------------- pure-JAX reference ----------------------------
def gru_model_reference(input_seq, adj, p):
    T, N, F = input_seq.shape
    Hd = p["W1"].shape[1]
    H = jnp.zeros((N, 2 * Hd), jnp.float32)
    a = None
    with jax.default_matmul_precision("highest"):
        for i in range(T):
            x = input_seq[i]
            e1, e2 = x @ p["Wa1"], x @ p["Wa2"]
            a = jax.nn.softmax(jnp.maximum(e1 @ e2.T + adj, 0.0), axis=-1)
            h1 = jnp.maximum(a @ (x @ p["W1"]), 0.0)
            h2 = jnp.maximum(a @ (h1 @ p["W2"]), 0.0)
            g = jnp.concatenate([h1, h2], axis=1)
            r = jax.nn.sigmoid(p["Wr_x"] @ g + p["Wr_h"] @ H + p["br"])
            u = jax.nn.sigmoid(p["Wu_x"] @ g + p["Wu_h"] @ H + p["bu"])
            c = jnp.tanh(p["Wc_x"] @ g + p["Wc_h"] @ (r * H) + p["bc"])
            H = u * H + (1.0 - u) * c
    return H, a


def make_params(key, N, F, Hd):
    ks = jax.random.split(key, 13)

    def xavier(k, shape):
        bound = (6.0 / (shape[0] + shape[1])) ** 0.5
        return jax.random.uniform(k, shape, jnp.float32, -bound, bound)

    return {
        "Wa1": xavier(ks[0], (F, F)),
        "Wa2": xavier(ks[1], (F, F)),
        "W1": xavier(ks[2], (F, Hd)),
        "W2": xavier(ks[3], (Hd, Hd)),
        "Wr_x": jax.random.normal(ks[4], (N, N), jnp.float32),
        "Wr_h": jax.random.normal(ks[5], (N, N), jnp.float32),
        "br": jax.random.normal(ks[6], (N, 1), jnp.float32),
        "Wu_x": jax.random.normal(ks[7], (N, N), jnp.float32),
        "Wu_h": jax.random.normal(ks[8], (N, N), jnp.float32),
        "bu": jax.random.normal(ks[9], (N, 1), jnp.float32),
        "Wc_x": jax.random.normal(ks[10], (N, N), jnp.float32),
        "Wc_h": jax.random.normal(ks[11], (N, N), jnp.float32),
        "bc": jax.random.normal(ks[12], (N, 1), jnp.float32),
    }


if __name__ == "__main__":
    # small shapes: Seq_len=4, nodes N=16, node features F=8, hidden=16
    T, N, F, Hd = 4, 16, 8, 16
    key = jax.random.PRNGKey(0)
    k_x, k_adj, k_p = jax.random.split(key, 3)

    input_seq = jax.random.normal(k_x, (T, N, F), jnp.float32)
    adj = jax.nn.softmax(jax.random.normal(k_adj, (N, N), jnp.float32), axis=-1)
    params = make_params(k_p, N, F, Hd)

    h, a_last = gru_model_forward(input_seq, adj, params)
    jax.block_until_ready((h, a_last))

    h_ref, a_ref = gru_model_reference(input_seq, adj, params)
    assert h.shape == (N, 2 * Hd) and a_last.shape == (N, N)
    # Tolerance note: the kernel folds Wa1@Wa2^T (f32 associativity change) and
    # uses the approximate EUP reciprocal in the softmax; observed differences
    # against the HIGHEST-precision reference stay well inside this band.
    assert jnp.allclose(h, h_ref, rtol=2e-2, atol=2e-2)
    assert jnp.allclose(a_last, a_ref, rtol=2e-2, atol=2e-2)

    print("KERNEL_OK")
</pallas_src>

<mosaic_0001>
module attributes {stable_mosaic.version = 11 : i64} {
  func.func @_gru_model_kernel(%arg0: memref<4x16x8xf32, #tpu.memory_space<vmem>>, %arg1: memref<16x16xf32, #tpu.memory_space<vmem>>, %arg2: memref<8x24xf32, #tpu.memory_space<vmem>>, %arg3: memref<16x16xf32, #tpu.memory_space<vmem>>, %arg4: memref<48x16xf32, #tpu.memory_space<vmem>>, %arg5: memref<48x16xf32, #tpu.memory_space<vmem>>, %arg6: memref<48x1xf32, #tpu.memory_space<vmem>>, %arg7: memref<16x32xf32, #tpu.memory_space<vmem>>, %arg8: memref<16x16xf32, #tpu.memory_space<vmem>>) attributes {dimension_semantics = [], scalar_prefetch = 0 : i64, scratch_operands = 0 : i64, tpu.core_type = #tpu.core_type<tc>} {
    %c0 = arith.constant 0 : index
    %c0_0 = arith.constant 0 : index
    %c0_1 = arith.constant 0 : index
    %0 = vector.load %arg0[%c0, %c0_0, %c0_1] : memref<4x16x8xf32, #tpu.memory_space<vmem>>, vector<4x16x8xf32>
    %1 = vector.shape_cast %0 : vector<4x16x8xf32> to vector<64x8xf32>
    %c0_2 = arith.constant 0 : index
    %c0_3 = arith.constant 0 : index
    %2 = vector.load %arg2[%c0_2, %c0_3] : memref<8x24xf32, #tpu.memory_space<vmem>>, vector<8x24xf32>
    %cst = arith.constant dense<0.000000e+00> : vector<64x24xf32>
    %3 = tpu.matmul %1, %2, %cst {dimension_numbers = #tpu.dot_dimension_numbers<[1], [0], [0], [1], [0, 0, 1, 1], [], []>} : vector<64x8xf32>, vector<8x24xf32>, vector<64x24xf32> -> vector<64x24xf32>
    %4 = vector.extract_strided_slice %3 {offsets = [0, 0], sizes = [64, 8], strides = [1, 1]} : vector<64x24xf32> to vector<64x8xf32>
    %5 = vector.shape_cast %4 : vector<64x8xf32> to vector<4x16x8xf32>
    %6 = vector.extract_strided_slice %3 {offsets = [0, 8], sizes = [64, 16], strides = [1, 1]} : vector<64x24xf32> to vector<64x16xf32>
    %7 = vector.shape_cast %6 : vector<64x16xf32> to vector<4x16x16xf32>
    "tpu.trace_start"() <{level = 10 : i32, message = "tnf,tmf->tnm"}> : () -> ()
    %cst_4 = arith.constant dense<0.000000e+00> : vector<4x16x16xf32>
    %8 = tpu.matmul %5, %0, %cst_4 {dimension_numbers = #tpu.dot_dimension_numbers<[2], [2], [1], [1], [0, 0, 0, 1, 1, 1], [0], [0]>} : vector<4x16x8xf32>, vector<4x16x8xf32>, vector<4x16x16xf32> -> vector<4x16x16xf32>
    "tpu.trace_stop"() : () -> ()
    %c0_5 = arith.constant 0 : index
    %c0_6 = arith.constant 0 : index
    %9 = vector.load %arg1[%c0_5, %c0_6] : memref<16x16xf32, #tpu.memory_space<vmem>>, vector<16x16xf32>
    %10 = vector.shape_cast %9 : vector<16x16xf32> to vector<1x16x16xf32>
    %11 = vector.broadcast %10 : vector<1x16x16xf32> to vector<4x16x16xf32>
    %12 = arith.addf %8, %11 : vector<4x16x16xf32>
    %cst_7 = arith.constant 0.000000e+00 : f32
    %13 = vector.broadcast %cst_7 : f32 to vector<4x16x16xf32>
    %14 = arith.maximumf %12, %13 : vector<4x16x16xf32>
    %cst_8 = arith.constant dense<0xFF800000> : vector<4x16xf32>
    %15 = vector.multi_reduction <maximumf>, %14, %cst_8 [2] : vector<4x16x16xf32> to vector<4x16xf32>
    %16 = vector.shape_cast %15 : vector<4x16xf32> to vector<4x16x1xf32>
    %17 = vector.broadcast %16 : vector<4x16x1xf32> to vector<4x16x16xf32>
    %18 = arith.subf %14, %17 : vector<4x16x16xf32>
    %19 = math.exp %18 : vector<4x16x16xf32>
    %cst_9 = arith.constant dense<0.000000e+00> : vector<4x16xf32>
    %20 = vector.multi_reduction <add>, %19, %cst_9 [2] : vector<4x16x16xf32> to vector<4x16xf32>
    %21 = vector.shape_cast %20 : vector<4x16xf32> to vector<4x16x1xf32>
    %22 = tpu.reciprocal %21 {approx = true} : vector<4x16x1xf32> -> vector<4x16x1xf32>
    %23 = vector.broadcast %22 : vector<4x16x1xf32> to vector<4x16x16xf32>
    %24 = arith.mulf %19, %23 : vector<4x16x16xf32>
    %25 = vector.extract_strided_slice %24 {offsets = [3, 0, 0], sizes = [1, 16, 16], strides = [1, 1, 1]} : vector<4x16x16xf32> to vector<1x16x16xf32>
    %26 = vector.shape_cast %25 : vector<1x16x16xf32> to vector<16x16xf32>
    %c0_10 = arith.constant 0 : index
    %c0_11 = arith.constant 0 : index
    %27 = vector.load %arg8[%c0_10, %c0_11] : memref<16x16xf32, #tpu.memory_space<vmem>>, vector<16x16xf32>
    tpu.vector_store %arg8[%c0_10, %c0_11], %26 {strides = array<i32>} : memref<16x16xf32, #tpu.memory_space<vmem>>, vector<16x16xf32>,
    "tpu.trace_start"() <{level = 10 : i32, message = "tnm,tmh->tnh"}> : () -> ()
    %cst_12 = arith.constant dense<0.000000e+00> : vector<4x16x16xf32>
    %28 = tpu.matmul %24, %7, %cst_12 {dimension_numbers = #tpu.dot_dimension_numbers<[2], [1], [1], [2], [0, 0, 0, 1, 1, 2], [0], [0]>} : vector<4x16x16xf32>, vector<4x16x16xf32>, vector<4x16x16xf32> -> vector<4x16x16xf32>
    "tpu.trace_stop"() : () -> ()
    %cst_13 = arith.constant 0.000000e+00 : f32
    %29 = vector.broadcast %cst_13 : f32 to vector<4x16x16xf32>
    %30 = arith.maximumf %28, %29 : vector<4x16x16xf32>
    %31 = vector.shape_cast %30 : vector<4x16x16xf32> to vector<64x16xf32>
    %c0_14 = arith.constant 0 : index
    %c0_15 = arith.constant 0 : index
    %32 = vector.load %arg3[%c0_14, %c0_15] : memref<16x16xf32, #tpu.memory_space<vmem>>, vector<16x16xf32>
    %cst_16 = arith.constant dense<0.000000e+00> : vector<64x16xf32>
    %33 = tpu.matmul %31, %32, %cst_16 {dimension_numbers = #tpu.dot_dimension_numbers<[1], [0], [0], [1], [0, 0, 1, 1], [], []>} : vector<64x16xf32>, vector<16x16xf32>, vector<64x16xf32> -> vector<64x16xf32>
    %34 = vector.shape_cast %33 : vector<64x16xf32> to vector<4x16x16xf32>
    "tpu.trace_start"() <{level = 10 : i32, message = "tnm,tmh->tnh"}> : () -> ()
    %cst_17 = arith.constant dense<0.000000e+00> : vector<4x16x16xf32>
    %35 = tpu.matmul %24, %34, %cst_17 {dimension_numbers = #tpu.dot_dimension_numbers<[2], [1], [1], [2], [0, 0, 0, 1, 1, 2], [0], [0]>} : vector<4x16x16xf32>, vector<4x16x16xf32>, vector<4x16x16xf32> -> vector<4x16x16xf32>
    "tpu.trace_stop"() : () -> ()
    %cst_18 = arith.constant 0.000000e+00 : f32
    %36 = vector.broadcast %cst_18 : f32 to vector<4x16x16xf32>
    %37 = arith.maximumf %35, %36 : vector<4x16x16xf32>
    %38 = vector.extract_strided_slice %30 {offsets = [0, 0, 0], sizes = [1, 16, 16], strides = [1, 1, 1]} : vector<4x16x16xf32> to vector<1x16x16xf32>
    %39 = vector.shape_cast %38 : vector<1x16x16xf32> to vector<16x16xf32>
    %40 = vector.extract_strided_slice %37 {offsets = [0, 0, 0], sizes = [1, 16, 16], strides = [1, 1, 1]} : vector<4x16x16xf32> to vector<1x16x16xf32>
    %41 = vector.shape_cast %40 : vector<1x16x16xf32> to vector<16x16xf32>
    %42 = vector.extract_strided_slice %30 {offsets = [1, 0, 0], sizes = [1, 16, 16], strides = [1, 1, 1]} : vector<4x16x16xf32> to vector<1x16x16xf32>
    %43 = vector.shape_cast %42 : vector<1x16x16xf32> to vector<16x16xf32>
    %44 = vector.extract_strided_slice %37 {offsets = [1, 0, 0], sizes = [1, 16, 16], strides = [1, 1, 1]} : vector<4x16x16xf32> to vector<1x16x16xf32>
    %45 = vector.shape_cast %44 : vector<1x16x16xf32> to vector<16x16xf32>
    %46 = vector.extract_strided_slice %30 {offsets = [2, 0, 0], sizes = [1, 16, 16], strides = [1, 1, 1]} : vector<4x16x16xf32> to vector<1x16x16xf32>
    %47 = vector.shape_cast %46 : vector<1x16x16xf32> to vector<16x16xf32>
    %48 = vector.extract_strided_slice %37 {offsets = [2, 0, 0], sizes = [1, 16, 16], strides = [1, 1, 1]} : vector<4x16x16xf32> to vector<1x16x16xf32>
    %49 = vector.shape_cast %48 : vector<1x16x16xf32> to vector<16x16xf32>
    %50 = vector.extract_strided_slice %30 {offsets = [3, 0, 0], sizes = [1, 16, 16], strides = [1, 1, 1]} : vector<4x16x16xf32> to vector<1x16x16xf32>
    %51 = vector.shape_cast %50 : vector<1x16x16xf32> to vector<16x16xf32>
    %52 = vector.extract_strided_slice %37 {offsets = [3, 0, 0], sizes = [1, 16, 16], strides = [1, 1, 1]} : vector<4x16x16xf32> to vector<1x16x16xf32>
    %53 = vector.shape_cast %52 : vector<1x16x16xf32> to vector<16x16xf32>
    %54 = tpu.concatenate %39, %41, %43, %45, %47, %49, %51, %53 in 1 : vector<16x16xf32>, vector<16x16xf32>, vector<16x16xf32>, vector<16x16xf32>, vector<16x16xf32>, vector<16x16xf32>, vector<16x16xf32>, vector<16x16xf32> -> vector<16x128xf32>
    %c0_19 = arith.constant 0 : index
    %c0_20 = arith.constant 0 : index
    %55 = vector.load %arg4[%c0_19, %c0_20] : memref<48x16xf32, #tpu.memory_space<vmem>>, vector<48x16xf32>
    %cst_21 = arith.constant dense<0.000000e+00> : vector<48x128xf32>
    %56 = tpu.matmul %55, %54, %cst_21 {dimension_numbers = #tpu.dot_dimension_numbers<[1], [0], [0], [1], [0, 0, 1, 1], [], []>} : vector<48x16xf32>, vector<16x128xf32>, vector<48x128xf32> -> vector<48x128xf32>
    %c0_22 = arith.constant 0 : index
    %c0_23 = arith.constant 0 : index
    %57 = vector.load %arg6[%c0_22, %c0_23] : memref<48x1xf32, #tpu.memory_space<vmem>>, vector<48x1xf32>
    %58 = vector.shape_cast %57 : vector<48x1xf32> to vector<48x1xf32>
    %59 = vector.broadcast %58 : vector<48x1xf32> to vector<48x128xf32>
    %60 = arith.addf %56, %59 : vector<48x128xf32>
    %61 = vector.extract_strided_slice %60 {offsets = [0, 0], sizes = [32, 128], strides = [1, 1]} : vector<48x128xf32> to vector<32x128xf32>
    %62 = vector.extract_strided_slice %60 {offsets = [32, 0], sizes = [16, 128], strides = [1, 1]} : vector<48x128xf32> to vector<16x128xf32>
    %c0_24 = arith.constant 0 : index
    %c0_25 = arith.constant 0 : index
    %63 = vector.load %arg5[%c0_24, %c0_25] : memref<48x16xf32, #tpu.memory_space<vmem>>, vector<48x16xf32>
    %64 = vector.extract_strided_slice %63 {offsets = [0, 0], sizes = [32, 16], strides = [1, 1]} : vector<48x16xf32> to vector<32x16xf32>
    %65 = vector.extract_strided_slice %63 {offsets = [32, 0], sizes = [16, 16], strides = [1, 1]} : vector<48x16xf32> to vector<16x16xf32>
    %66 = vector.extract_strided_slice %61 {offsets = [0, 0], sizes = [32, 32], strides = [1, 1]} : vector<32x128xf32> to vector<32x32xf32>
    %67 = arith.negf %66 : vector<32x32xf32>
    %68 = math.exp %67 : vector<32x32xf32>
    %cst_26 = arith.constant 1.000000e+00 : f32
    %69 = vector.broadcast %cst_26 : f32 to vector<32x32xf32>
    %70 = arith.addf %69, %68 : vector<32x32xf32>
    %71 = arith.divf %69, %70 : vector<32x32xf32>
    %72 = vector.extract_strided_slice %71 {offsets = [16, 0], sizes = [16, 32], strides = [1, 1]} : vector<32x32xf32> to vector<16x32xf32>
    %cst_27 = arith.constant 1.000000e+00 : f32
    %73 = vector.broadcast %cst_27 : f32 to vector<16x32xf32>
    %74 = arith.subf %73, %72 : vector<16x32xf32>
    %75 = vector.extract_strided_slice %62 {offsets = [0, 0], sizes = [16, 32], strides = [1, 1]} : vector<16x128xf32> to vector<16x32xf32>
    %76 = math.tanh %75 : vector<16x32xf32>
    %77 = arith.mulf %74, %76 : vector<16x32xf32>
    %cst_28 = arith.constant dense<0.000000e+00> : vector<32x32xf32>
    %78 = tpu.matmul %64, %77, %cst_28 {dimension_numbers = #tpu.dot_dimension_numbers<[1], [0], [0], [1], [0, 0, 1, 1], [], []>} : vector<32x16xf32>, vector<16x32xf32>, vector<32x32xf32> -> vector<32x32xf32>
    %79 = vector.extract_strided_slice %61 {offsets = [0, 32], sizes = [32, 32], strides = [1, 1]} : vector<32x128xf32> to vector<32x32xf32>
    %80 = arith.addf %78, %79 : vector<32x32xf32>
    %81 = arith.negf %80 : vector<32x32xf32>
    %82 = math.exp %81 : vector<32x32xf32>
    %cst_29 = arith.constant 1.000000e+00 : f32
    %83 = vector.broadcast %cst_29 : f32 to vector<32x32xf32>
    %84 = arith.addf %83, %82 : vector<32x32xf32>
    %85 = arith.divf %83, %84 : vector<32x32xf32>
    %86 = vector.extract_strided_slice %85 {offsets = [0, 0], sizes = [16, 32], strides = [1, 1]} : vector<32x32xf32> to vector<16x32xf32>
    %87 = vector.extract_strided_slice %85 {offsets = [16, 0], sizes = [16, 32], strides = [1, 1]} : vector<32x32xf32> to vector<16x32xf32>
    %88 = arith.mulf %86, %77 : vector<16x32xf32>
    %cst_30 = arith.constant dense<0.000000e+00> : vector<16x32xf32>
    %89 = tpu.matmul %65, %88, %cst_30 {dimension_numbers = #tpu.dot_dimension_numbers<[1], [0], [0], [1], [0, 0, 1, 1], [], []>} : vector<16x16xf32>, vector<16x32xf32>, vector<16x32xf32> -> vector<16x32xf32>
    %90 = vector.extract_strided_slice %62 {offsets = [0, 32], sizes = [16, 32], strides = [1, 1]} : vector<16x128xf32> to vector<16x32xf32>
    %91 = arith.addf %89, %90 : vector<16x32xf32>
    %92 = math.tanh %91 : vector<16x32xf32>
    %93 = arith.mulf %87, %77 : vector<16x32xf32>
    %cst_31 = arith.constant 1.000000e+00 : f32
    %94 = vector.broadcast %cst_31 : f32 to vector<16x32xf32>
    %95 = arith.subf %94, %87 : vector<16x32xf32>
    %96 = arith.mulf %95, %92 : vector<16x32xf32>
    %97 = arith.addf %93, %96 : vector<16x32xf32>
    %cst_32 = arith.constant dense<0.000000e+00> : vector<32x32xf32>
    %98 = tpu.matmul %64, %97, %cst_32 {dimension_numbers = #tpu.dot_dimension_numbers<[1], [0], [0], [1], [0, 0, 1, 1], [], []>} : vector<32x16xf32>, vector<16x32xf32>, vector<32x32xf32> -> vector<32x32xf32>
    %99 = vector.extract_strided_slice %61 {offsets = [0, 64], sizes = [32, 32], strides = [1, 1]} : vector<32x128xf32> to vector<32x32xf32>
    %100 = arith.addf %98, %99 : vector<32x32xf32>
    %101 = arith.negf %100 : vector<32x32xf32>
    %102 = math.exp %101 : vector<32x32xf32>
    %cst_33 = arith.constant 1.000000e+00 : f32
    %103 = vector.broadcast %cst_33 : f32 to vector<32x32xf32>
    %104 = arith.addf %103, %102 : vector<32x32xf32>
    %105 = arith.divf %103, %104 : vector<32x32xf32>
    %106 = vector.extract_strided_slice %105 {offsets = [0, 0], sizes = [16, 32], strides = [1, 1]} : vector<32x32xf32> to vector<16x32xf32>
    %107 = vector.extract_strided_slice %105 {offsets = [16, 0], sizes = [16, 32], strides = [1, 1]} : vector<32x32xf32> to vector<16x32xf32>
    %108 = arith.mulf %106, %97 : vector<16x32xf32>
    %cst_34 = arith.constant dense<0.000000e+00> : vector<16x32xf32>
    %109 = tpu.matmul %65, %108, %cst_34 {dimension_numbers = #tpu.dot_dimension_numbers<[1], [0], [0], [1], [0, 0, 1, 1], [], []>} : vector<16x16xf32>, vector<16x32xf32>, vector<16x32xf32> -> vector<16x32xf32>
    %110 = vector.extract_strided_slice %62 {offsets = [0, 64], sizes = [16, 32], strides = [1, 1]} : vector<16x128xf32> to vector<16x32xf32>
    %111 = arith.addf %109, %110 : vector<16x32xf32>
    %112 = math.tanh %111 : vector<16x32xf32>
    %113 = arith.mulf %107, %97 : vector<16x32xf32>
    %cst_35 = arith.constant 1.000000e+00 : f32
    %114 = vector.broadcast %cst_35 : f32 to vector<16x32xf32>
    %115 = arith.subf %114, %107 : vector<16x32xf32>
    %116 = arith.mulf %115, %112 : vector<16x32xf32>
    %117 = arith.addf %113, %116 : vector<16x32xf32>
    %cst_36 = arith.constant dense<0.000000e+00> : vector<32x32xf32>
    %118 = tpu.matmul %64, %117, %cst_36 {dimension_numbers = #tpu.dot_dimension_numbers<[1], [0], [0], [1], [0, 0, 1, 1], [], []>} : vector<32x16xf32>, vector<16x32xf32>, vector<32x32xf32> -> vector<32x32xf32>
    %119 = vector.extract_strided_slice %61 {offsets = [0, 96], sizes = [32, 32], strides = [1, 1]} : vector<32x128xf32> to vector<32x32xf32>
    %120 = arith.addf %118, %119 : vector<32x32xf32>
    %121 = arith.negf %120 : vector<32x32xf32>
    %122 = math.exp %121 : vector<32x32xf32>
    %cst_37 = arith.constant 1.000000e+00 : f32
    %123 = vector.broadcast %cst_37 : f32 to vector<32x32xf32>
    %124 = arith.addf %123, %122 : vector<32x32xf32>
    %125 = arith.divf %123, %124 : vector<32x32xf32>
    %126 = vector.extract_strided_slice %125 {offsets = [0, 0], sizes = [16, 32], strides = [1, 1]} : vector<32x32xf32> to vector<16x32xf32>
    %127 = vector.extract_strided_slice %125 {offsets = [16, 0], sizes = [16, 32], strides = [1, 1]} : vector<32x32xf32> to vector<16x32xf32>
    %128 = arith.mulf %126, %117 : vector<16x32xf32>
    %cst_38 = arith.constant dense<0.000000e+00> : vector<16x32xf32>
    %129 = tpu.matmul %65, %128, %cst_38 {dimension_numbers = #tpu.dot_dimension_numbers<[1], [0], [0], [1], [0, 0, 1, 1], [], []>} : vector<16x16xf32>, vector<16x32xf32>, vector<16x32xf32> -> vector<16x32xf32>
    %130 = vector.extract_strided_slice %62 {offsets = [0, 96], sizes = [16, 32], strides = [1, 1]} : vector<16x128xf32> to vector<16x32xf32>
    %131 = arith.addf %129, %130 : vector<16x32xf32>
    %132 = math.tanh %131 : vector<16x32xf32>
    %133 = arith.mulf %127, %117 : vector<16x32xf32>
    %cst_39 = arith.constant 1.000000e+00 : f32
    %134 = vector.broadcast %cst_39 : f32 to vector<16x32xf32>
    %135 = arith.subf %134, %127 : vector<16x32xf32>
    %136 = arith.mulf %135, %132 : vector<16x32xf32>
    %137 = arith.addf %133, %136 : vector<16x32xf32>
    %c0_40 = arith.constant 0 : index
    %c0_41 = arith.constant 0 : index
    %138 = vector.load %arg7[%c0_40, %c0_41] : memref<16x32xf32, #tpu.memory_space<vmem>>, vector<16x32xf32>
    tpu.vector_store %arg7[%c0_40, %c0_41], %137 {strides = array<i32>} : memref<16x32xf32, #tpu.memory_space<vmem>>, vector<16x32xf32>,
    return
  }
}

</mosaic_0001>

<bundles_post_ra>
// kernel: tpu_custom_call.1
= control target key start
LH: loop header
LB: loop body
LE: loop exit
PB: predicated region body
PF: predicated region fallthrough
CT: control target
= control target key end

     0   :  { %14 = vsyncpa [#allocation3], 0  ;;  %vm39_vm0 = vcmask 64512   ;;  %s3493_s0 = inlined_call_operand.vmem [shape: f32[4,16,8], index: 0, kind: input, shape index: {}]   ;;  %s3494_s1 = inlined_call_operand.vmem [shape: f32[16,16], index: 1, kind: input, shape index: {}]   ;;  %s3495_s2 = inlined_call_operand.vmem [shape: f32[8,24], index: 2, kind: input, shape index: {}]   ;;  %s3496_s3 = inlined_call_operand.vmem [shape: f32[16,16], index: 3, kind: input, shape index: {}]   ;;  %s3497_s4 = inlined_call_operand.vmem [shape: f32[48,16], index: 4, kind: input, shape index: {}]   ;;  %s3498_s5 = inlined_call_operand.vmem [shape: f32[48,16], index: 5, kind: input, shape index: {}]   ;;  %s3499_s6 = inlined_call_operand.vmem [shape: f32[48,1], index: 6, kind: input, shape index: {}]   ;;  %s3500_s7 = inlined_call_operand.hbm [shape: f32[16,32], index: 7, kind: output, shape index: {0}]   ;;  %s3501_s8 = inlined_call_operand.hbm [shape: f32[16,16], index: 8, kind: output, shape index: {1}]  }
   0x1   :  { %v38_v0 = vld [vmem:[%s3495_s2] sm:$0xff]  ;;  %v31_v2 = vld [vmem:[%s3493_s0 + $0x8] sm:$0xff]  ;;  %v32_v3 = vld [vmem:[%s3493_s0 + $0x10] sm:$0xff] }
   0x2   :  { %v30_v1 = vld [vmem:[%s3493_s0] sm:$0xff]  ;;  %2529 = vmatprep.subr.mxu0 %v38_v0  ;;  %v33_v4 = vld [vmem:[%s3493_s0 + $0x18] sm:$0xff]  ;;  %v35_v8 = vld [vmem:[%s3493_s0 + $0x28] sm:$0xff] }
   0x3   :  { %2531 = vmatprep.mubr.msk.f32.mxu0 %vm39_vm0, %v30_v1  ;;  %v34_v5 = vld [vmem:[%s3493_s0 + $0x20] sm:$0xff]  ;;  %v2707_v6 = vpack.c.bf16 %v31_v2, %v30_v1  ;;  %2530 = vmatpush3.msra.mxu0 %v38_v0  ;;  %v2713_v7 = vpack.c.bf16 %v33_v4, %v32_v3  ;;  %v36_v9 = vld [vmem:[%s3493_s0 + $0x30] sm:$0xff]  ;;  %v37_v10 = vld [vmem:[%s3493_s0 + $0x38] sm:$0xff] }
   0x4   :  { %2532 = vmatmul.mubr.msk.f32.vlgmr.msra.gmra.mrb[0].mxu0 %vm39_vm0, %v31_v2  ;;  %v2719_v11 = vpack.c.bf16 %v35_v8, %v34_v5  ;;  %v2725_v12 = vpack.c.bf16 %v37_v10, %v36_v9  ;;  %vm3106_vm1 = vmpackc.low %vm39_vm0, %vm39_vm0 }
   0x5   :  { %2534 = vmatprep.mubr.msk.f32.mxu0 %vm39_vm0, %v32_v3  ;;  %2709 = vmatprep.subr.msk.bf16.mxu1 %vm3106_vm1, %v2707_v6 }
   0x6   :  { %15 = vsyncpa [#allocation5], 0  ;;  %2712 = vmatpush3.bf16.xpose.msk.msra.mxu1 %vm3106_vm1, %v2707_v6  ;;  %2721 = vmatprep.subr.msk.bf16.mxu0 %vm3106_vm1, %v2719_v11  ;;  %v170_v26 = vld [vmem:[%s3494_s1 + $0x8] sm:$0xff]  ;;  %v169_v27 = vld [vmem:[%s3494_s1] sm:$0xff]  ;;  %vm503_vm2 = vcmask 130048   ;;  %s3017_s1 = smov 120  }
   0x7   :  { %2715 = vmatprep.subr.msk.bf16.mxu1 %vm3106_vm1, %v2713_v7  ;;  %s3019_s29 = smov 64   ;;  %s3020_s30 = smov 96   ;;  %vm1441_vm3 = vcmask 261120   ;;  %vm1444_vm4 = vcmask 392192   ;;  %vm1447_vm5 = vcmask 523264   ;;  %vm1450_vm6 = vcmask 654336  }
   0x8   :  { %2535 = vmatmul.mubr.msk.f32.gmra.mrb[2].mxu0 %vm39_vm0, %v33_v4  ;;  %s3021_s9 = smov 16   ;;  %s3022_s10 = smov 48   ;;  %vm1453_vm7 = vcmask 785408   ;;  %vm1456_vm8 = vcmask 916480  }
   0x9   :  { %2537 = vmatprep.mubr.msk.f32.mxu0 %vm39_vm0, %v34_v5  ;;  %s3023_s13 = smov 80   ;;  %s3024_s14 = smov 112  }
   0xa   :  { %2724 = vmatpush3.bf16.xpose.msk.msra.mxu0 %vm3106_vm1, %v2719_v11 }
   0xc   :  { %2538 = vmatmul.mubr.msk.f32.gmra.mrb[4].mxu0 %vm39_vm0, %v35_v8 }
   0xd   :  { %2540 = vmatprep.mubr.msk.f32.mxu0 %vm39_vm0, %v36_v9 }
  0x10   :  { %2541 = vmatmul.mubr.msk.f32.gmra.mrb[6].mxu0 %vm39_vm0, %v37_v10 }
  0xd7   :  { %v3126_v14 = vpop.f32.mrb[0].mxu0 }
  0xd8   :  { %v3128_v15 = vpop.f32.mrb[1].mxu0 }
  0xd9   :  { %v2808_v16 = vpack.i.bf16 %v3126_v14, %v3128_v15  ;;  %2547 = vmatprep.mubr.msk.f32.mxu1 %vm39_vm0, %v3128_v15 }
  0xda   :  { %2548 = vmatmul.mubr.msk.f32.vlgmr.msra.gmra.mrb[0].mxu1 %vm39_vm0, %v3126_v14 }
  0xdb   :  { %2718 = vmatpush3.bf16.xpose.msk.msra.mxu1 %vm3106_vm1, %v2713_v7  ;;  %v3138_v17 = vpop.f32.mrb[2].mxu0 }
  0xdc   :  { %v3140_v18 = vpop.f32.mrb[3].mxu0  ;;  %2727 = vmatprep.subr.msk.bf16.mxu1 %vm3106_vm1, %v2725_v12 }
  0xdd   :  { %v2813_v19 = vpack.i.bf16 %v3138_v17, %v3140_v18  ;;  %2554 = vmatprep.mubr.msk.f32.mxu1 %vm39_vm0, %v3140_v18 }
  0xdf   :  { %v3148_v20 = vpop.f32.mrb[4].mxu0 }
  0xe0   :  { %v3150_v21 = vpop.f32.mrb[5].mxu0 }
  0xe1   :  { %v2818_v22 = vpack.i.bf16 %v3148_v20, %v3150_v21  ;;  %2561 = vmatprep.mubr.msk.f32.mxu0 %vm39_vm0, %v3150_v21 }
  0xe2   :  { %2555 = vmatmul.mubr.msk.f32.vlgmr.msra.gmra.mrb[2].mxu1 %vm39_vm0, %v3138_v17  ;;  %2562 = vmatmul.mubr.msk.f32.vlgmr.msra.gmra.mrb[8].mxu0 %vm39_vm0, %v3148_v20 }
  0xe3   :  { %2730 = vmatpush3.bf16.xpose.msk.msra.mxu1 %vm3106_vm1, %v2725_v12  ;;  %v3162_v23 = vpop.f32.mrb[6].mxu0 }
  0xe4   :  { %v3164_v24 = vpop.f32.mrb[7].mxu0 }
  0xe5   :  { %v2823_v25 = vpack.i.bf16 %v3162_v23, %v3164_v24  ;;  %2568 = vmatprep.mubr.msk.f32.mxu1 %vm39_vm0, %v3164_v24 }
  0xea   :  { %2569 = vmatmul.mubr.msk.f32.vlgmr.msra.gmra.mrb[4].mxu1 %vm39_vm0, %v3162_v23 }
 0x1ad   :  { %v2549_v28 = vpop.f32.mrb[0].mxu1 }
 0x1ae   :  { %v243_v29 = vpop.f32.mrb[1].mxu1  ;;  %v249_v30 = vadd.f32 %v2549_v28, %v170_v26 }
 0x1af   :  { %v244_v31 = vadd.f32 %v243_v29, %v169_v27 }
 0x1b0   :  { %v496_v33 = vmax.f32 %v249_v30, 0.0 }
 0x1b1   :  { %v495_v32 = vmax.f32 %v244_v31, 0.0 }
 0x1b2   :  { %v507_v42 = vsel %vm503_vm2, %v496_v33, -inf }
 0x1b3   :  { %v504_v34 = vsel %vm503_vm2, %v495_v32, -inf }
 0x1b4   :  { %505 = vmax.xlane.f32.xlu0 %v504_v34 }
 0x1b5   :  { %v2556_v35 = vpop.f32.mrb[2].mxu1  ;;  %v2563_v36 = vpop.f32.mrb[8].mxu0 }
 0x1b6   :  { %v324_v37 = vpop.f32.mrb[3].mxu1  ;;  %v405_v38 = vpop.f32.mrb[9].mxu0  ;;  %v330_v39 = vadd.f32 %v2556_v35, %v170_v26  ;;  %v411_v46 = vadd.f32 %v2563_v36, %v170_v26 }
 0x1b7   :  { %v325_v40 = vadd.f32 %v324_v37, %v169_v27  ;;  %v406_v41 = vadd.f32 %v405_v38, %v169_v27 }
 0x1b8   :  { %508 = vmax.xlane.f32.xlu0 %v507_v42  ;;  %v498_v45 = vmax.f32 %v330_v39, 0.0  ;;  %v500_v51 = vmax.f32 %v411_v46, 0.0 }
 0x1b9   :  { %v497_v43 = vmax.f32 %v325_v40, 0.0  ;;  %v499_v44 = vmax.f32 %v406_v41, 0.0 }
 0x1ba   :  { %v513_v54 = vsel %vm503_vm2, %v498_v45, -inf  ;;  %v519_v57 = vsel %vm503_vm2, %v500_v51, -inf }
 0x1bb   :  { %v510_v47 = vsel %vm503_vm2, %v497_v43, -inf  ;;  %v516_v48 = vsel %vm503_vm2, %v499_v44, -inf }
 0x1bc   :  { %511 = vmax.xlane.f32.xlu1 %v510_v47  ;;  %517 = vmax.xlane.f32.xlu0 %v516_v48 }
 0x1bd   :  { %v2570_v49 = vpop.f32.mrb[4].mxu1 }
 0x1be   :  { %v486_v50 = vpop.f32.mrb[5].mxu1  ;;  %v492_v52 = vadd.f32 %v2570_v49, %v170_v26 }
 0x1bf   :  { %v487_v53 = vadd.f32 %v486_v50, %v169_v27 }
 0x1c0   :  { %514 = vmax.xlane.f32.xlu1 %v513_v54  ;;  %v502_v56 = vmax.f32 %v492_v52, 0.0 }
 0x1c1   :  { %v501_v55 = vmax.f32 %v487_v53, 0.0 }
 0x1c2   :  { %v525_v59 = vsel %vm503_vm2, %v502_v56, -inf }
 0x1c3   :  { %v522_v58 = vsel %vm503_vm2, %v501_v55, -inf }
 0x1c4   :  { %520 = vmax.xlane.f32.xlu1 %v519_v57  ;;  %523 = vmax.xlane.f32.xlu0 %v522_v58 }
 0x1c8   :  { %526 = vmax.xlane.f32.xlu1 %v525_v59 }
 0x241   :  { %v506_v60 = vpop.xlane.xlu0 %505 }
 0x242   :  { %v528_v61 = vsub.f32 %v495_v32, %v506_v60 }
 0x244   :  { %v536_v62 = vmul.f32 1.442695, %v528_v61 }
 0x245   :  { %v509_v63 = vpop.xlane.xlu0 %508 }
 0x246   :  { %2865 = vpow2.f32 %v536_v62  ;;  %v529_v0 = vsub.f32 %v496_v33, %v509_v63 }
 0x248   :  { %v538_v1 = vmul.f32 1.442695, %v529_v0 }
 0x249   :  { %v512_v2 = vpop.xlane.xlu1 %511  ;;  %v518_v3 = vpop.xlane.xlu0 %517 }
 0x24a   :  { %2867 = vpow2.f32 %v538_v1  ;;  %v530_v4 = vsub.f32 %v497_v43, %v512_v2  ;;  %v532_v5 = vsub.f32 %v499_v44, %v518_v3 }
 0x24c   :  { %v540_v6 = vmul.f32 1.442695, %v530_v4  ;;  %v544_v7 = vmul.f32 1.442695, %v532_v5 }
 0x24d   :  { %v515_v8 = vpop.xlane.xlu1 %514 }
 0x24e   :  { %2869 = vpow2.f32 %v540_v6  ;;  %v531_v9 = vsub.f32 %v498_v45, %v515_v8 }
 0x24f   :  { %2871 = vpow2.f32 %v544_v7 }
 0x250   :  { %v2866_v10 = vpop.eup %2865  ;;  %v542_v11 = vmul.f32 1.442695, %v531_v9 }
 0x251   :  { %v521_v12 = vpop.xlane.xlu1 %520  ;;  %v524_v13 = vpop.xlane.xlu0 %523  ;;  %v552_v26 = vsel %vm503_vm2, %v2866_v10, 0.0 }
 0x252   :  { %2873 = vpow2.f32 %v542_v11  ;;  %v533_v27 = vsub.f32 %v500_v51, %v521_v12  ;;  %v534_v28 = vsub.f32 %v501_v55, %v524_v13  ;;  %553 = vadd.xlane.f32.xlu0 %v552_v26  ;;  %v950_v12 = vld [vmem:[%s3496_s3] sm:$0xff]  ;;  %v951_v13 = vld [vmem:[%s3496_s3 + $0x8] sm:$0xff]  ;;  %s3018_s3 = smov 32  }
 0x253   :  { %v2747_v26 = vpack.c.bf16 %v951_v13, %v950_v12 }
 0x254   :  { %v3187_v29 = vpop.eup %2867  ;;  %v546_v30 = vmul.f32 1.442695, %v533_v27  ;;  %v548_v31 = vmul.f32 1.442695, %v534_v28 }
 0x255   :  { %v527_v32 = vpop.xlane.xlu1 %526  ;;  %v555_v33 = vsel %vm503_vm2, %v3187_v29, 0.0 }
 0x256   :  { %2875 = vpow2.f32 %v546_v30  ;;  %v535_v34 = vsub.f32 %v502_v56, %v527_v32  ;;  %556 = vadd.xlane.f32.xlu1 %v555_v33 }
 0x257   :  { %2877 = vpow2.f32 %v548_v31 }
 0x258   :  { %v3191_v35 = vpop.eup %2869  ;;  %v550_v36 = vmul.f32 1.442695, %v535_v34 }
 0x259   :  { %v558_v37 = vsel %vm503_vm2, %v3191_v35, 0.0  ;;  %v2872_v38 = vpop.eup %2871 }
 0x25a   :  { %2879 = vpow2.f32 %v550_v36  ;;  %559 = vadd.xlane.f32.xlu0 %v558_v37  ;;  %v564_v41 = vsel %vm503_vm2, %v2872_v38, 0.0 }
 0x25c   :  { %v3195_v39 = vpop.eup %2873 }
 0x25d   :  { %v561_v40 = vsel %vm503_vm2, %v3195_v39, 0.0 }
 0x25e   :  { %562 = vadd.xlane.f32.xlu1 %v561_v40  ;;  %565 = vadd.xlane.f32.xlu0 %v564_v41 }
 0x260   :  { %v3200_v42 = vpop.eup %2875 }
 0x261   :  { %v2878_v43 = vpop.eup %2877  ;;  %v567_v44 = vsel %vm503_vm2, %v3200_v42, 0.0 }
 0x262   :  { %568 = vadd.xlane.f32.xlu1 %v567_v44  ;;  %v570_v45 = vsel %vm503_vm2, %v2878_v43, 0.0 }
 0x263   :  { %571 = vadd.xlane.f32.xlu0 %v570_v45 }
 0x264   :  { %v2880_v46 = vpop.eup %2879 }
 0x265   :  { %v573_v47 = vsel %vm503_vm2, %v2880_v46, 0.0 }
 0x266   :  { %574 = vadd.xlane.f32.xlu1 %v573_v47 }
 0x277   :  { %2814 = vrot.lane.b32.xlu1 %v2813_v19, %s3017_s1 }
 0x279   :  { %2809 = vrot.lane.b32.xlu0 %v2808_v16, %s3017_s1 }
 0x27b   :  { %2819 = vrot.lane.b32.xlu1 %v2818_v22, %s3017_s1 }
 0x27f   :  { %2824 = vrot.lane.b32.xlu1 %v2823_v25, %s3017_s1 }
 0x2df   :  { %v554_v48 = vpop.xlane.xlu0 %553 }
 0x2e0   :  { %2881 = vrcp.f32 %v554_v48 }
 0x2e3   :  { %v557_v49 = vpop.xlane.xlu1 %556 }
 0x2e7   :  { %v560_v50 = vpop.xlane.xlu0 %559 }
 0x2ea   :  { %v2882_v51 = vpop.eup %2881 }
 0x2eb   :  { %v563_v52 = vpop.xlane.xlu1 %562  ;;  %v566_v17 = vpop.xlane.xlu0 %565  ;;  %v584_v18 = vmul.f32 %v2882_v51, %v2866_v10 }
 0x2ec   :  { %2883 = vrcp.f32 %v566_v17 }
 0x2ed   :  { %2575 = vmatprep.mubr.msk.f32.mxu0 %vm503_vm2, %v584_v18  ;;  %2885 = vrcp.f32 %v557_v49 }
 0x2ee   :  { %2887 = vrcp.f32 %v560_v50 }
 0x2ef   :  { %v569_v14 = vpop.xlane.xlu1 %568 }
 0x2f0   :  { %v572_v15 = vpop.xlane.xlu0 %571 }
 0x2f1   :  { %2889 = vrcp.f32 %v572_v15 }
 0x2f2   :  { %2891 = vrcp.f32 %v563_v52 }
 0x2f3   :  { %v575_v16 = vpop.xlane.xlu1 %574 }
 0x2f4   :  { %2893 = vrcp.f32 %v575_v16  ;;  %v2810_v19 = vpop.permute.xlu0 %2809 }
 0x2f5   :  { %2895 = vrcp.f32 %v569_v14  ;;  %v2812_v20 = vunpack.i.h.bf16 %v2810_v19  ;;  %v2811_v21 = vunpack.i.l.bf16 %v2810_v19 }
 0x2f6   :  { %v2884_v22 = vpop.eup %2883 }
 0x2f7   :  { %v2731_v23 = vpack.c.bf16 %v2812_v20, %v2811_v21  ;;  %v2815_v24 = vpop.permute.xlu1 %2814  ;;  %v2886_v25 = vpop.eup %2885  ;;  %v3219_v55 = vmul.f32 %v2884_v22, %v2872_v38 }
 0x2f8   :  { %v2817_v53 = vunpack.i.h.bf16 %v2815_v24  ;;  %v2816_v54 = vunpack.i.l.bf16 %v2815_v24  ;;  %v2888_v56 = vpop.eup %2887  ;;  %v3224_v59 = vmul.f32 %v2886_v25, %v3187_v29 }
 0x2f9   :  { %2732 = vmatprep.subr.bf16.mxu0 %v2731_v23  ;;  %2589 = vmatprep.mubr.msk.f32.mxu1 %vm503_vm2, %v3219_v55  ;;  %v3227_v0 = vmul.f32 %v2888_v56, %v3191_v35 }
 0x2fa   :  { %v2735_v57 = vpack.c.bf16 %v2817_v53, %v2816_v54  ;;  %2734 = vmatpush3.bf16.msra.mxu0 %v2731_v23 }
 0x2fb   :  { %v2890_v58 = vpop.eup %2889  ;;  %v2820_v60 = vpop.permute.xlu1 %2819 }
 0x2fc   :  { %v2892_v61 = vpop.eup %2891  ;;  %v2822_v62 = vunpack.i.h.bf16 %v2820_v60  ;;  %v2821_v63 = vunpack.i.l.bf16 %v2820_v60  ;;  %2736 = vmatprep.subr.bf16.mxu0 %v2735_v57  ;;  %v3229_v1 = vmul.f32 %v2890_v58, %v2878_v43  ;;  %v1459_v60 = vld [vmem:[%s3497_s4] sm:$0xff] }
 0x2fd   :  { %2576 = vmatmul.mubr.msk.f32.vlgmr.msra.gmra.mrb[10].mxu0 %vm503_vm2, %v3224_v59  ;;  %v3238_v5 = vmul.f32 %v2892_v61, %v3195_v39 }
 0x2fe   :  { %v2894_v2 = vpop.eup %2893  ;;  %v2739_v3 = vpack.c.bf16 %v2822_v62, %v2821_v63  ;;  %2738 = vmatpush3.bf16.msra.mxu0 %v2735_v57  ;;  %2582 = vmatprep.mubr.msk.f32.mxu0 %vm503_vm2, %v3227_v0  ;;  %592 = vst.msk [vmem:[#allocation4] sm:$0xff] %vm503_vm2, %v3229_v1 }
 0x2ff   :  { %v2896_v4 = vpop.eup %2895  ;;  %v3240_v6 = vmul.f32 %v2894_v2, %v2880_v46  ;;  %v2825_v7 = vpop.permute.xlu1 %2824 }
 0x300   :  { %v2827_v8 = vunpack.i.h.bf16 %v2825_v7  ;;  %v2826_v9 = vunpack.i.l.bf16 %v2825_v7  ;;  %2740 = vmatprep.subr.bf16.mxu1 %v2739_v3  ;;  %v3247_v10 = vmul.f32 %v2896_v4, %v3200_v42  ;;  %v3025_v4 = vmov 0   ;;  %v1465_v7 = vld [vmem:[%s3499_s6] sm:$0xff] }
 0x301   :  { %593 = vst.msk [vmem:[#allocation4 + $0x8] sm:$0xff] %vm503_vm2, %v3240_v6  ;;  %2583 = vmatmul.mubr.msk.f32.vlgmr.msra.gmra.mrb[12].mxu0 %vm503_vm2, %v3238_v5  ;;  %2742 = vmatpush3.bf16.msra.mxu1 %v2739_v3  ;;  %v1467_v3 = vld [vmem:[%s3499_s6 + $0x10] sm:$0xff] }
 0x302   :  { %v2743_v11 = vpack.c.bf16 %v2827_v8, %v2826_v9  ;;  %2596 = vmatprep.mubr.msk.f32.mxu0 %vm503_vm2, %v3229_v1  ;;  %2748 = vmatprep.subr.bf16.mxu1 %v2747_v26  ;;  %v1470_v8 = vld [vmem:[%s3499_s6 + $0x28] sm:$0xff] }
 0x303   :  { %2863 = vset.pattern.permute.xlu1 %v3025_v4  ;;  %2864 = vset.pattern.permute.xlu0 %v3025_v4  ;;  %v1466_v9 = vld [vmem:[%s3499_s6 + $0x8] sm:$0xff] }
 0x304   :  { %2590 = vmatmul.mubr.msk.f32.vlgmr.msra.gmra.mrb[6].mxu1 %vm503_vm2, %v3247_v10  ;;  %2744 = vmatprep.subr.bf16.mxu0 %v2743_v11 }
 0x305   :  { %2746 = vmatpush3.bf16.msra.mxu0 %v2743_v11  ;;  %2750 = vmatpush3.bf16.msra.mxu1 %v2747_v26 }
 0x308   :  { %2597 = vmatmul.mubr.msk.f32.vlgmr.msra.gmra.mrb[14].mxu0 %vm503_vm2, %v3240_v6 }
 0x309   :  { %2619 = vmatprep.mubr.msk.f32.mxu0 %vm503_vm2, %v584_v18 }
 0x3d0   :  { %v3262_v27 = vpop.f32.mrb[10].mxu0 }
 0x3d1   :  { %v3264_v28 = vpop.f32.mrb[11].mxu0  ;;  %v943_v30 = vmax.f32 %v3262_v27, 0.0 }
 0x3d2   :  { %v942_v29 = vmax.f32 %v3264_v28, 0.0 }
 0x3d4   :  { %v2584_v31 = vpop.f32.mrb[12].mxu0  ;;  %2603 = vmatprep.mubr.msk.f32.mxu1 %vm503_vm2, %v942_v29 }
 0x3d5   :  { %v945_v32 = vmax.f32 %v2584_v31, 0.0  ;;  %v759_v33 = vpop.f32.mrb[13].mxu0  ;;  %2604 = vmatmul.mubr.msk.f32.vlgmr.msra.gmra.mrb[8].mxu1 %vm503_vm2, %v943_v30 }
 0x3d6   :  { %v944_v34 = vmax.f32 %v759_v33, 0.0 }
 0x3d7   :  { %v2591_v35 = vpop.f32.mrb[6].mxu1 }
 0x3d8   :  { %v2828_v36 = vpack.i.bf16 %v945_v32, %v944_v34  ;;  %v947_v37 = vmax.f32 %v2591_v35, 0.0  ;;  %2606 = vmatprep.mubr.msk.f32.mxu1 %vm503_vm2, %v944_v34  ;;  %v846_v38 = vpop.f32.mrb[7].mxu1 }
 0x3d9   :  { %v946_v39 = vmax.f32 %v846_v38, 0.0  ;;  %2607 = vmatmul.mubr.msk.f32.gmra.mrb[10].mxu1 %vm503_vm2, %v945_v32 }
 0x3da   :  { %2829 = vrot.lane.b32.xlu1 %v2828_v36, %s3018_s3 }
 0x3db   :  { %v2833_v40 = vpack.i.bf16 %v947_v37, %v946_v39  ;;  %v2598_v41 = vpop.f32.mrb[14].mxu0  ;;  %2609 = vmatprep.mubr.msk.f32.mxu1 %vm503_vm2, %v946_v39 }
 0x3dc   :  { %v949_v42 = vmax.f32 %v2598_v41, 0.0  ;;  %v933_v43 = vpop.f32.mrb[15].mxu0 }
 0x3dd   :  { %v948_v44 = vmax.f32 %v933_v43, 0.0  ;;  %2610 = vmatmul.mubr.msk.f32.gmra.mrb[12].mxu1 %vm503_vm2, %v947_v37 }
 0x3de   :  { %2834 = vrot.lane.b32.xlu1 %v2833_v40, %s3019_s29 }
 0x3df   :  { %v2838_v45 = vpack.i.bf16 %v949_v42, %v948_v44  ;;  %2612 = vmatprep.mubr.msk.f32.mxu1 %vm503_vm2, %v948_v44 }
 0x3e1   :  { %2613 = vmatmul.mubr.msk.f32.gmra.mrb[14].mxu1 %vm503_vm2, %v949_v42 }
 0x3e2   :  { %2839 = vrot.lane.b32.xlu1 %v2838_v45, %s3020_s30  ;;  %2647 = vmatprep.mubr.msk.f32.mxu1 %vm503_vm2, %v1459_v60 }
 0x3e6   :  { %1483 = vperm.xlu1 %2863, %v1467_v3  }
 0x4a8   :  { %v2605_v46 = vpop.f32.mrb[8].mxu1 }
 0x4a9   :  { %v1042_v47 = vpop.f32.mrb[9].mxu1 }
 0x4aa   :  { %v2751_v48 = vpack.c.bf16 %v2605_v46, %v1042_v47 }
 0x4ac   :  { %v2608_v49 = vpop.f32.mrb[10].mxu1  ;;  %2752 = vmatprep.subr.bf16.mxu0 %v2751_v48 }
 0x4ad   :  { %v1052_v50 = vpop.f32.mrb[11].mxu1  ;;  %2754 = vmatpush3.bf16.msra.mxu0 %v2751_v48 }
 0x4ae   :  { %v2755_v51 = vpack.c.bf16 %v2608_v49, %v1052_v50 }
 0x4b0   :  { %v2611_v52 = vpop.f32.mrb[12].mxu1  ;;  %2620 = vmatmul.mubr.msk.f32.vlgmr.msra.gmra.mrb[16].mxu0 %vm503_vm2, %v3224_v59  ;;  %2756 = vmatprep.subr.bf16.mxu0 %v2755_v51 }
 0x4b1   :  { %v1062_v17 = vpop.f32.mrb[13].mxu1  ;;  %2758 = vmatpush3.bf16.msra.mxu0 %v2755_v51  ;;  %2626 = vmatprep.mubr.msk.f32.mxu0 %vm503_vm2, %v3227_v0 }
 0x4b2   :  { %v2759_v18 = vpack.c.bf16 %v2611_v52, %v1062_v17 }
 0x4b4   :  { %v2614_v14 = vpop.f32.mrb[14].mxu1  ;;  %2627 = vmatmul.mubr.msk.f32.vlgmr.msra.gmra.mrb[18].mxu0 %vm503_vm2, %v3238_v5  ;;  %2760 = vmatprep.subr.bf16.mxu0 %v2759_v18  ;;  %v1468_v5 = vld [vmem:[%s3499_s6 + $0x18] sm:$0xff] }
 0x4b5   :  { %v1072_v15 = vpop.f32.mrb[15].mxu1  ;;  %2762 = vmatpush3.bf16.msra.mxu0 %v2759_v18  ;;  %2633 = vmatprep.mubr.msk.f32.mxu0 %vm503_vm2, %v3219_v55 }
 0x4b6   :  { %v2763_v16 = vpack.c.bf16 %v2614_v14, %v1072_v15 }
 0x4b8   :  { %2634 = vmatmul.mubr.msk.f32.vlgmr.msra.gmra.mrb[20].mxu0 %vm503_vm2, %v3247_v10  ;;  %2764 = vmatprep.subr.bf16.mxu0 %v2763_v16  ;;  %v2830_v10 = vpop.permute.xlu1 %2829 }
 0x4b9   :  { %2766 = vmatpush3.bf16.msra.mxu0 %v2763_v16  ;;  %2640 = vmatprep.mubr.msk.f32.mxu0 %vm503_vm2, %v3229_v1  ;;  %v2832_v33 = vunpack.i.h.bf16 %v2830_v10  ;;  %v2831_v34 = vunpack.i.l.bf16 %v2830_v10 }
 0x4bc   :  { %2641 = vmatmul.mubr.msk.f32.vlgmr.msra.gmra.mrb[22].mxu0 %vm503_vm2, %v3240_v6  ;;  %v1469_v6 = vld [vmem:[%s3499_s6 + $0x20] sm:$0xff]  ;;  %v2835_v26 = vpop.permute.xlu1 %2834 }
 0x4bd   :  { %1493 = vperm.xlu1 %2863, %v1469_v6   ;;  %v2837_v27 = vunpack.i.h.bf16 %v2835_v26 }
 0x4c0   :  { %v2840_v42 = vpop.permute.xlu1 %2839 }
 0x4c1   :  { %1498 = vperm.xlu1 %2863, %v1470_v8   ;;  %v2842_v48 = vunpack.i.h.bf16 %v2840_v42  ;;  %v2841_v49 = vunpack.i.l.bf16 %v2840_v42 }
 0x4c5   :  { %1478 = vperm.xlu1 %2863, %v1466_v9  }
 0x583   :  { %v2621_v19 = vpop.f32.mrb[16].mxu0 }
 0x584   :  { %v1382_v20 = vmax.f32 %v2621_v19, 0.0  ;;  %v1147_v21 = vpop.f32.mrb[17].mxu0  ;;  %v1460_v19 = vld [vmem:[%s3497_s4 + $0x8] sm:$0xff] }
 0x585   :  { %v1381_v22 = vmax.f32 %v1147_v21, 0.0  ;;  %v1462_v21 = vld [vmem:[%s3497_s4 + $0x18] sm:$0xff] }
 0x587   :  { %v2843_v23 = vpack.i.bf16 %v1382_v20, %v1381_v22  ;;  %v2628_v24 = vpop.f32.mrb[18].mxu0  ;;  %v1461_v20 = vld [vmem:[%s3497_s4 + $0x10] sm:$0xff]  ;;  %v1463_v22 = vld [vmem:[%s3497_s4 + $0x20] sm:$0xff] }
 0x588   :  { %v1384_v25 = vmax.f32 %v2628_v24, 0.0  ;;  %v1222_v53 = vpop.f32.mrb[19].mxu0  ;;  %v3350_v24 = vld [vmem:[%s3498_s5] sm:$0xff] }
 0x589   :  { %v1383_v54 = vmax.f32 %v1222_v53, 0.0  ;;  %2844 = vrot.lane.b32.xlu0 %v2843_v23, %s3021_s9  ;;  %v1464_v23 = vld [vmem:[%s3497_s4 + $0x28] sm:$0xff]  ;;  %2660 = vmatprep.mubr.msk.f32.mxu0 %vm503_vm2, %v3350_v24 }
 0x58b   :  { %v2848_v55 = vpack.i.bf16 %v1384_v25, %v1383_v54  ;;  %v2635_v56 = vpop.f32.mrb[20].mxu0  ;;  %v1484_v25 = vpop.permute.xlu1 %1483 }
 0x58c   :  { %v1386_v57 = vmax.f32 %v2635_v56, 0.0  ;;  %v1297_v58 = vpop.f32.mrb[21].mxu0 }
 0x58d   :  { %v1385_v59 = vmax.f32 %v1297_v58, 0.0  ;;  %2849 = vrot.lane.b32.xlu0 %v2848_v55, %s3022_s10 }
 0x58f   :  { %v2853_v61 = vpack.i.bf16 %v1386_v57, %v1385_v59  ;;  %v2642_v62 = vpop.f32.mrb[22].mxu0  ;;  %v1494_v53 = vpop.permute.xlu1 %1493 }
 0x590   :  { %v1388_v63 = vmax.f32 %v2642_v62, 0.0  ;;  %v1372_v0 = vpop.f32.mrb[23].mxu0 }
 0x591   :  { %v1387_v1 = vmax.f32 %v1372_v0, 0.0  ;;  %2854 = vrot.lane.b32.xlu0 %v2853_v61, %s3023_s13 }
 0x593   :  { %v2858_v2 = vpack.i.bf16 %v1388_v63, %v1387_v1  ;;  %v1499_v54 = vpop.permute.xlu1 %1498 }
 0x595   :  { %2859 = vrot.lane.b32.xlu0 %v2858_v2, %s3024_s14 }
 0x597   :  { %v1479_v56 = vpop.permute.xlu1 %1478 }
 0x599   :  { %1488 = vperm.xlu0 %2864, %v1468_v5  }
 0x59d   :  { %1473 = vperm.xlu0 %2864, %v1465_v7  }
 0x5fb   :  { %v2845_v11 = vpop.permute.xlu0 %2844 }
 0x5fc   :  { %v2847_v12 = vunpack.i.h.bf16 %v2845_v11  ;;  %v2846_v13 = vunpack.i.l.bf16 %v2845_v11 }
 0x5fe   :  { %v1440_v31 = vsel %vm503_vm2, %v943_v30, %v2847_v12  ;;  %v1439_v32 = vsel %vm503_vm2, %v942_v29, %v2846_v13  ;;  %v2836_v30 = vunpack.i.l.bf16 %v2835_v26 }
 0x5ff   :  { %v2850_v35 = vpop.permute.xlu0 %2849  ;;  %v1442_v38 = vsel %vm1441_vm3, %v1439_v32, %v2831_v34  ;;  %v1443_v39 = vsel %vm1441_vm3, %v1440_v31, %v2832_v33 }
 0x600   :  { %v2852_v36 = vunpack.i.h.bf16 %v2850_v35  ;;  %v2851_v37 = vunpack.i.l.bf16 %v2850_v35 }
 0x602   :  { %v1446_v40 = vsel %vm1444_vm4, %v1443_v39, %v2852_v36  ;;  %v1445_v41 = vsel %vm1444_vm4, %v1442_v38, %v2851_v37  ;;  %v3383_v37 = vld [vmem:[%s3498_s5 + $0x8] sm:$0xff]  ;;  %v3388_v38 = vld [vmem:[%s3498_s5 + $0x10] sm:$0xff]  ;;  %v3397_v39 = vld [vmem:[%s3498_s5 + $0x18] sm:$0xff] }
 0x603   :  { %v2855_v28 = vpop.permute.xlu0 %2854  ;;  %v1448_v44 = vsel %vm1447_vm5, %v1445_v41, %v2836_v30  ;;  %v1449_v45 = vsel %vm1447_vm5, %v1446_v40, %v2837_v27  ;;  %v3404_v40 = vld [vmem:[%s3498_s5 + $0x20] sm:$0xff] }
 0x604   :  { %v2857_v29 = vunpack.i.h.bf16 %v2855_v28  ;;  %v2856_v43 = vunpack.i.l.bf16 %v2855_v28 }
 0x606   :  { %v1452_v46 = vsel %vm1450_vm6, %v1449_v45, %v2857_v29  ;;  %v1451_v47 = vsel %vm1450_vm6, %v1448_v44, %v2856_v43 }
 0x607   :  { %v2860_v50 = vpop.permute.xlu0 %2859  ;;  %v1454_v17 = vsel %vm1453_vm7, %v1451_v47, %v2841_v49  ;;  %v1455_v18 = vsel %vm1453_vm7, %v1452_v46, %v2842_v48 }
 0x608   :  { %v2862_v51 = vunpack.i.h.bf16 %v2860_v50  ;;  %v2861_v52 = vunpack.i.l.bf16 %v2860_v50 }
 0x60a   :  { %v1457_v14 = vsel %vm1456_vm8, %v1454_v17, %v2861_v52  ;;  %v1458_v15 = vsel %vm1456_vm8, %v1455_v18, %v2862_v51 }
 0x60b   :  { %v2767_v16 = vpack.c.bf16 %v1458_v15, %v1457_v14  ;;  %v3413_v15 = vld [vmem:[%s3498_s5 + $0x28] sm:$0xff]  ;;  %s3026_s5 = smov [#allocation4]  }
 0x60c   :  { %s2323_s20 = sshll.u32 %s3026_s5, 4  ;;  %s2324_s20 = int_to_ptr.vmem [resolvable:$true] %s2323_s20 }
 0x60d   :  { %2768 = vmatprep.subr.bf16.mxu1 %v2767_v16  ;;  %s2969_s21 = scalar_lea.vmem %s2324_s20, 256  ;;  %p2974_p1 = scmp.lt.s32.totalorder %s2324_s20, %s2324_s20 }
 0x60e   :  { %2770 = vmatpush3.bf16.msra.mxu1 %v2767_v16  ;;  %p2970_p0 = scmp.ne.s32.totalorder %s2324_s20, %s2969_s21  ;;  %p2975_p2 = scmp.lt.s32.totalorder %s2969_s21, %s2969_s21 }
 0x610   :  { %p2976_p3 = por %p2975_p2, %p2974_p1 }
 0x611   :  { %2648 = vmatmul.mubr.msk.f32.vlgmr.msra.gmra.mrb[16].mxu1 %vm503_vm2, %v1460_v19 }
 0x612   :  { %2650 = vmatprep.mubr.msk.f32.mxu1 %vm503_vm2, %v1461_v20  ;;  %p2977_p4 = pnand %p2976_p3, %p2970_p0 }
 0x615   :  { %2651 = vmatmul.mubr.msk.f32.gmra.mrb[18].mxu1 %vm503_vm2, %v1462_v21 }
 0x616   :  { %2653 = vmatprep.mubr.msk.f32.mxu1 %vm503_vm2, %v1463_v22 }
 0x618   :  { %v1489_v55 = vpop.permute.xlu0 %1488 }
 0x619   :  { %2654 = vmatmul.mubr.msk.f32.gmra.mrb[20].mxu1 %vm503_vm2, %v1464_v23 }
 0x61a   :  { %2677 = vmatprep.mubr.msk.f32.mxu1 %vm503_vm2, %v3350_v24 }
 0x61c   :  { %v1474_v57 = vpop.permute.xlu0 %1473 }
 0x6e4   :  { %v2649_v58 = vpop.f32.mrb[16].mxu1 }
 0x6e5   :  { %v1591_v59 = vadd.f32 %v2649_v58, %v1479_v56  ;;  %v1585_v60 = vpop.f32.mrb[17].mxu1 }
 0x6e6   :  { %v1586_v61 = vadd.f32 %v1585_v60, %v1474_v57 }
 0x6e7   :  { %1644 = vrot.lane.b32.xlu1 %v1591_v59, %s3020_s30 }
 0x6e8   :  { %v2652_v62 = vpop.f32.mrb[18].mxu1  ;;  %1642 = vrot.lane.b32.xlu0 %v1586_v61, %s3020_s30 }
 0x6e9   :  { %v1601_v63 = vadd.f32 %v2652_v62, %v1489_v55  ;;  %v1595_v0 = vpop.f32.mrb[19].mxu1 }
 0x6ea   :  { %v1596_v1 = vadd.f32 %v1595_v0, %v1484_v25 }
 0x6eb   :  { %v2393_v2 = vmul.f32 -1.442695, %v1601_v63  ;;  %1648 = vrot.lane.b32.xlu1 %v1601_v63, %s3020_s30 }
 0x6ec   :  { %v2392_v3 = vmul.f32 -1.442695, %v1596_v1  ;;  %v2655_v4 = vpop.f32.mrb[20].mxu1  ;;  %1646 = vrot.lane.b32.xlu0 %v1596_v1, %s3020_s30 }
 0x6ed   :  { %2897 = vpow2.f32 %v2393_v2  ;;  %v1611_v5 = vadd.f32 %v2655_v4, %v1499_v54  ;;  %v1605_v6 = vpop.f32.mrb[21].mxu1 }
 0x6ee   :  { %2899 = vpow2.f32 %v2392_v3  ;;  %v1606_v7 = vadd.f32 %v1605_v6, %v1494_v53 }
 0x6ef   :  { %1781 = vrot.lane.b32.xlu1 %v1611_v5, %s3020_s30 }
 0x6f0   :  { %1779 = vrot.lane.b32.xlu0 %v1606_v7, %s3020_s30 }
 0x6f3   :  { %1878 = vrot.lane.b32.xlu1 %v1591_v59, %s3019_s29 }
 0x6f4   :  { %1876 = vrot.lane.b32.xlu0 %v1586_v61, %s3019_s29 }
 0x6f7   :  { %v2898_v8 = vpop.eup %2897  ;;  %1882 = vrot.lane.b32.xlu1 %v1601_v63, %s3019_s29 }
 0x6f8   :  { %v2900_v9 = vpop.eup %2899  ;;  %v1627_v10 = vadd.f32 1.0, %v2898_v8  ;;  %1880 = vrot.lane.b32.xlu0 %v1596_v1, %s3019_s29 }
 0x6f9   :  { %v1626_v11 = vadd.f32 1.0, %v2900_v9 }
 0x6fa   :  { %2901 = vrcp.f32 %v1627_v10 }
 0x6fb   :  { %2903 = vrcp.f32 %v1626_v11  ;;  %2001 = vrot.lane.b32.xlu1 %v1611_v5, %s3019_s29 }
 0x6fc   :  { %2905 = vtanh.f32 %v1611_v5  ;;  %1999 = vrot.lane.b32.xlu0 %v1606_v7, %s3019_s29 }
 0x6fd   :  { %2907 = vtanh.f32 %v1606_v7 }
 0x6ff   :  { %2092 = vrot.lane.b32.xlu1 %v1591_v59, %s3018_s3 }
 0x700   :  { %2090 = vrot.lane.b32.xlu0 %v1586_v61, %s3018_s3 }
 0x703   :  { %2096 = vrot.lane.b32.xlu1 %v1601_v63, %s3018_s3 }
 0x704   :  { %v2902_v12 = vpop.eup %2901  ;;  %2094 = vrot.lane.b32.xlu0 %v1596_v1, %s3018_s3 }
 0x705   :  { %v2904_v13 = vpop.eup %2903  ;;  %v1633_v26 = vsub.f32 1.0, %v2902_v12 }
 0x706   :  { %v2906_v31 = vpop.eup %2905  ;;  %v1632_v32 = vsub.f32 1.0, %v2904_v13 }
 0x707   :  { %v2908_v33 = vpop.eup %2907  ;;  %2215 = vrot.lane.b32.xlu1 %v1611_v5, %s3018_s3  ;;  %v3373_v34 = vmul.f32 %v2906_v31, %v1633_v26 }
 0x708   :  { %2213 = vrot.lane.b32.xlu0 %v1606_v7, %s3018_s3  ;;  %v3376_v35 = vmul.f32 %v2908_v33, %v1632_v32 }
 0x70a   :  { %v2771_v36 = vpack.c.bf16 %v3373_v34, %v3376_v35 }
 0x70c   :  { %2772 = vmatprep.subr.bf16.mxu0 %v2771_v36 }
 0x70d   :  { %2774 = vmatpush3.bf16.msra.mxu0 %v2771_v36 }
 0x710   :  { %2661 = vmatmul.mubr.msk.f32.vlgmr.msra.gmra.mrb[24].mxu0 %vm503_vm2, %v3383_v37 }
 0x711   :  { %2663 = vmatprep.mubr.msk.f32.mxu0 %vm503_vm2, %v3388_v38 }
 0x714   :  { %2664 = vmatmul.mubr.msk.f32.gmra.mrb[26].mxu0 %vm503_vm2, %v3397_v39 }
 0x715   :  { %2670 = vmatprep.mubr.msk.f32.mxu0 %vm503_vm2, %v3404_v40 }
 0x759   :  { %v1645_v41 = vpop.permute.xlu1 %1644 }
 0x75a   :  { %v1643_v30 = vpop.permute.xlu0 %1642 }
 0x75d   :  { %v1649_v16 = vpop.permute.xlu1 %1648 }
 0x75e   :  { %v1647_v19 = vpop.permute.xlu0 %1646 }
 0x761   :  { %v1782_v56 = vpop.permute.xlu1 %1781 }
 0x762   :  { %v1780_v58 = vpop.permute.xlu0 %1779 }
 0x765   :  { %v1879_v11 = vpop.permute.xlu1 %1878 }
 0x766   :  { %v1877_v13 = vpop.permute.xlu0 %1876 }
 0x7e3   :  { %v2662_v27 = vpop.f32.mrb[24].mxu0 }
 0x7e4   :  { %v1738_v28 = vadd.f32 %v2662_v27, %v1645_v41  ;;  %v1732_v42 = vpop.f32.mrb[25].mxu0 }
 0x7e5   :  { %v1733_v29 = vadd.f32 %v1732_v42, %v1643_v30 }
 0x7e6   :  { %v2399_v43 = vmul.f32 -1.442695, %v1738_v28 }
 0x7e7   :  { %v2398_v44 = vmul.f32 -1.442695, %v1733_v29  ;;  %v2665_v45 = vpop.f32.mrb[26].mxu0 }
 0x7e8   :  { %2909 = vpow2.f32 %v2399_v43  ;;  %v1742_v46 = vpop.f32.mrb[27].mxu0  ;;  %v1748_v20 = vadd.f32 %v2665_v45, %v1649_v16  ;;  %v1883_v45 = vpop.permute.xlu1 %1882 }
 0x7e9   :  { %2911 = vpow2.f32 %v2398_v44  ;;  %v1743_v21 = vadd.f32 %v1742_v46, %v1647_v19  ;;  %v1881_v46 = vpop.permute.xlu0 %1880 }
 0x7ea   :  { %v2401_v22 = vmul.f32 -1.442695, %v1748_v20 }
 0x7eb   :  { %v2400_v23 = vmul.f32 -1.442695, %v1743_v21 }
 0x7ed   :  { %v2000_v19 = vpop.permute.xlu0 %1999 }
 0x7f2   :  { %v2910_v47 = vpop.eup %2909 }
 0x7f3   :  { %v2912_v48 = vpop.eup %2911  ;;  %v1764_v49 = vadd.f32 1.0, %v2910_v47 }
 0x7f4   :  { %v1763_v50 = vadd.f32 1.0, %v2912_v48 }
 0x7f5   :  { %2913 = vrcp.f32 %v1764_v49 }
 0x7f6   :  { %2915 = vrcp.f32 %v1763_v50 }
 0x7f7   :  { %2917 = vpow2.f32 %v2401_v22 }
 0x7f8   :  { %2919 = vpow2.f32 %v2400_v23 }
 0x7ff   :  { %v2914_v51 = vpop.eup %2913 }
 0x800   :  { %v2916_v52 = vpop.eup %2915  ;;  %v1776_v17 = vmul.f32 %v2914_v51, %v3373_v34 }
 0x801   :  { %v1775_v18 = vmul.f32 %v2916_v52, %v3376_v35  ;;  %v2918_v25 = vpop.eup %2917 }
 0x802   :  { %v2920_v53 = vpop.eup %2919  ;;  %v1766_v54 = vadd.f32 1.0, %v2918_v25 }
 0x803   :  { %v2775_v14 = vpack.c.bf16 %v1776_v17, %v1775_v18  ;;  %v1765_v55 = vadd.f32 1.0, %v2920_v53 }
 0x804   :  { %2921 = vrcp.f32 %v1766_v54 }
 0x805   :  { %2776 = vmatprep.subr.bf16.mxu0 %v2775_v14  ;;  %2923 = vrcp.f32 %v1765_v55 }
 0x806   :  { %2778 = vmatpush3.bf16.msra.mxu0 %v2775_v14  ;;  %v2002_v14 = vpop.permute.xlu1 %2001 }
 0x809   :  { %2671 = vmatmul.mubr.msk.f32.vlgmr.msra.gmra.mrb[28].mxu0 %vm503_vm2, %v3413_v15 }
 0x80a   :  { %2687 = vmatprep.mubr.msk.f32.mxu0 %vm503_vm2, %v3404_v40 }
 0x80e   :  { %v2922_v62 = vpop.eup %2921 }
 0x80f   :  { %v2924_v63 = vpop.eup %2923  ;;  %v1871_v0 = vsub.f32 1.0, %v2922_v62  ;;  %v1869_v4 = vmul.f32 %v2922_v62, %v3373_v34 }
 0x810   :  { %v1870_v2 = vsub.f32 1.0, %v2924_v63  ;;  %v1868_v6 = vmul.f32 %v2924_v63, %v3376_v35  ;;  %v2093_v63 = vpop.permute.xlu1 %2092 }
 0x8dc   :  { %v2672_v57 = vpop.f32.mrb[28].mxu0 }
 0x8dd   :  { %v1863_v59 = vadd.f32 %v2672_v57, %v1782_v56  ;;  %v1857_v60 = vpop.f32.mrb[29].mxu0 }
 0x8de   :  { %v1858_v61 = vadd.f32 %v1857_v60, %v1780_v58 }
 0x8df   :  { %2925 = vtanh.f32 %v1863_v59 }
 0x8e0   :  { %2927 = vtanh.f32 %v1858_v61 }
 0x8e9   :  { %v2926_v1 = vpop.eup %2925 }
 0x8ea   :  { %v2928_v3 = vpop.eup %2927  ;;  %v1873_v5 = vmul.f32 %v2926_v1, %v1871_v0  ;;  %v2091_v1 = vpop.permute.xlu0 %2090 }
 0x8eb   :  { %v1872_v7 = vmul.f32 %v2928_v3, %v1870_v2 }
 0x8ec   :  { %v3421_v8 = vadd.f32 %v1873_v5, %v1869_v4 }
 0x8ed   :  { %v3423_v9 = vadd.f32 %v1872_v7, %v1868_v6 }
 0x8ef   :  { %v2779_v10 = vpack.c.bf16 %v3421_v8, %v3423_v9 }
 0x8f1   :  { %2780 = vmatprep.subr.bf16.mxu1 %v2779_v10 }
 0x8f2   :  { %2782 = vmatpush3.bf16.msra.mxu1 %v2779_v10 }
 0x8f5   :  { %2678 = vmatmul.mubr.msk.f32.vlgmr.msra.gmra.mrb[22].mxu1 %vm503_vm2, %v3383_v37 }
 0x8f6   :  { %2680 = vmatprep.mubr.msk.f32.mxu1 %vm503_vm2, %v3388_v38 }
 0x8f9   :  { %2681 = vmatmul.mubr.msk.f32.gmra.mrb[24].mxu1 %vm503_vm2, %v3397_v39 }
 0x8fa   :  { %2704 = vmatprep.mubr.msk.f32.mxu1 %vm503_vm2, %v3404_v40 }
 0x9c8   :  { %v2679_v12 = vpop.f32.mrb[22].mxu1 }
 0x9c9   :  { %v1960_v26 = vadd.f32 %v2679_v12, %v1879_v11  ;;  %v1954_v31 = vpop.f32.mrb[23].mxu1 }
 0x9ca   :  { %v1955_v32 = vadd.f32 %v1954_v31, %v1877_v13 }
 0x9cb   :  { %v2409_v33 = vmul.f32 -1.442695, %v1960_v26 }
 0x9cc   :  { %v2408_v34 = vmul.f32 -1.442695, %v1955_v32  ;;  %v2682_v35 = vpop.f32.mrb[24].mxu1 }
 0x9cd   :  { %2929 = vpow2.f32 %v2409_v33  ;;  %v1964_v36 = vpop.f32.mrb[25].mxu1  ;;  %v1970_v47 = vadd.f32 %v2682_v35, %v1883_v45 }
 0x9ce   :  { %2931 = vpow2.f32 %v2408_v34  ;;  %v1965_v48 = vadd.f32 %v1964_v36, %v1881_v46 }
 0x9cf   :  { %v2411_v49 = vmul.f32 -1.442695, %v1970_v47 }
 0x9d0   :  { %v2410_v50 = vmul.f32 -1.442695, %v1965_v48 }
 0x9d7   :  { %v2930_v41 = vpop.eup %2929 }
 0x9d8   :  { %v2932_v27 = vpop.eup %2931  ;;  %v1986_v30 = vadd.f32 1.0, %v2930_v41 }
 0x9d9   :  { %v1985_v28 = vadd.f32 1.0, %v2932_v27 }
 0x9da   :  { %2933 = vrcp.f32 %v1986_v30 }
 0x9db   :  { %2935 = vrcp.f32 %v1985_v28 }
 0x9dc   :  { %2937 = vpow2.f32 %v2411_v49 }
 0x9dd   :  { %2939 = vpow2.f32 %v2410_v50 }
 0x9e4   :  { %v2934_v42 = vpop.eup %2933 }
 0x9e5   :  { %v2936_v40 = vpop.eup %2935  ;;  %v1998_v29 = vmul.f32 %v2934_v42, %v3421_v8 }
 0x9e6   :  { %v1997_v43 = vmul.f32 %v2936_v40, %v3423_v9  ;;  %v2938_v51 = vpop.eup %2937 }
 0x9e7   :  { %v2940_v52 = vpop.eup %2939  ;;  %v1988_v17 = vadd.f32 1.0, %v2938_v51 }
 0x9e8   :  { %v2783_v44 = vpack.c.bf16 %v1998_v29, %v1997_v43  ;;  %v1987_v18 = vadd.f32 1.0, %v2940_v52 }
 0x9e9   :  { %2941 = vrcp.f32 %v1988_v17 }
 0x9ea   :  { %2784 = vmatprep.subr.bf16.mxu0 %v2783_v44  ;;  %2943 = vrcp.f32 %v1987_v18 }
 0x9eb   :  { %2786 = vmatpush3.bf16.msra.mxu0 %v2783_v44 }
 0x9ee   :  { %2688 = vmatmul.mubr.msk.f32.vlgmr.msra.gmra.mrb[30].mxu0 %vm503_vm2, %v3413_v15 }
 0x9ef   :  { %2694 = vmatprep.mubr.msk.f32.mxu0 %vm503_vm2, %v3350_v24 }
 0x9f3   :  { %v2942_v22 = vpop.eup %2941 }
 0x9f4   :  { %v2944_v23 = vpop.eup %2943  ;;  %v2085_v25 = vsub.f32 1.0, %v2942_v22  ;;  %v2083_v56 = vmul.f32 %v2942_v22, %v3421_v8 }
 0x9f5   :  { %v2084_v54 = vsub.f32 1.0, %v2944_v23  ;;  %v2082_v58 = vmul.f32 %v2944_v23, %v3423_v9 }
 0xac1   :  { %v2689_v16 = vpop.f32.mrb[30].mxu0 }
 0xac2   :  { %v2077_v20 = vadd.f32 %v2689_v16, %v2002_v14  ;;  %v2071_v21 = vpop.f32.mrb[31].mxu0 }
 0xac3   :  { %v2072_v24 = vadd.f32 %v2071_v21, %v2000_v19 }
 0xac4   :  { %2945 = vtanh.f32 %v2077_v20 }
 0xac5   :  { %2947 = vtanh.f32 %v2072_v24 }
 0xace   :  { %v2946_v53 = vpop.eup %2945 }
 0xacf   :  { %v2948_v55 = vpop.eup %2947  ;;  %v2087_v57 = vmul.f32 %v2946_v53, %v2085_v25 }
 0xad0   :  { %v2086_v59 = vmul.f32 %v2948_v55, %v2084_v54 }
 0xad1   :  { %v3443_v60 = vadd.f32 %v2087_v57, %v2083_v56 }
 0xad2   :  { %v3445_v61 = vadd.f32 %v2086_v59, %v2082_v58 }
 0xad4   :  { %v2787_v62 = vpack.c.bf16 %v3443_v60, %v3445_v61 }
 0xad6   :  { %2788 = vmatprep.subr.bf16.mxu0 %v2787_v62 }
 0xad7   :  { %2790 = vmatpush3.bf16.msra.mxu0 %v2787_v62 }
 0xada   :  { %2695 = vmatmul.mubr.msk.f32.vlgmr.msra.gmra.mrb[32].mxu0 %vm503_vm2, %v3383_v37 }
 0xadb   :  { %2697 = vmatprep.mubr.msk.f32.mxu0 %vm503_vm2, %v3388_v38 }
 0xade   :  { %2698 = vmatmul.mubr.msk.f32.gmra.mrb[34].mxu0 %vm503_vm2, %v3397_v39 }
 0xbad   :  { %v2696_v0 = vpop.f32.mrb[32].mxu0 }
 0xbae   :  { %v2174_v2 = vadd.f32 %v2696_v0, %v2093_v63  ;;  %v2168_v3 = vpop.f32.mrb[33].mxu0 }
 0xbaf   :  { %v2169_v4 = vadd.f32 %v2168_v3, %v2091_v1 }
 0xbb0   :  { %v2419_v5 = vmul.f32 -1.442695, %v2174_v2 }
 0xbb1   :  { %v2418_v6 = vmul.f32 -1.442695, %v2169_v4  ;;  %v2699_v7 = vpop.f32.mrb[34].mxu0 }
 0xbb2   :  { %2949 = vpow2.f32 %v2419_v5  ;;  %v2178_v8 = vpop.f32.mrb[35].mxu0 }
 0xbb3   :  { %2951 = vpow2.f32 %v2418_v6 }
 0xbbc   :  { %v2950_v9 = vpop.eup %2949 }
 0xbbd   :  { %v2952_v37 = vpop.eup %2951  ;;  %v2200_v10 = vadd.f32 1.0, %v2950_v9 }
 0xbbe   :  { %v2199_v11 = vadd.f32 1.0, %v2952_v37 }
 0xbbf   :  { %2953 = vrcp.f32 %v2200_v10 }
 0xbc0   :  { %2955 = vrcp.f32 %v2199_v11 }
 0xbc9   :  { %v2954_v38 = vpop.eup %2953 }
 0xbca   :  { %v2956_v39 = vpop.eup %2955  ;;  %v2212_v12 = vmul.f32 %v2954_v38, %v3443_v60 }
 0xbcb   :  { %v2211_v13 = vmul.f32 %v2956_v39, %v3445_v61 }
 0xbcd   :  { %v2791_v26 = vpack.c.bf16 %v2212_v12, %v2211_v13 }
 0xbcf   :  { %2792 = vmatprep.subr.bf16.mxu1 %v2791_v26 }
 0xbd0   :  { %2794 = vmatpush3.bf16.msra.mxu1 %v2791_v26 }
 0xbd3   :  { %2705 = vmatmul.mubr.msk.f32.vlgmr.msra.gmra.mrb[26].mxu1 %vm503_vm2, %v3413_v15 }
 0xbd4   :  { %2980 = shalt.err (!%p2977_p4)
}
 0xbd5   :  { %s2981_s23 = scalar_lea.hbm %s3501_s8, 256 }
 0xbd6   :  { %p2982_p5 = scmp.ne.s32.totalorder %s3501_s8, %s2981_s23  ;;  %p2985_p6 = scmp.lt.u32.totalorder %s2981_s23, %s3501_s8 }
 0xbd8   :  { %p2987_p7 = pnand %p2985_p6, %p2982_p5 }
 0xbda   :  { %2990 = shalt.err (!%p2987_p7)
}
 0xbdb   :  { %s3027_s26 = smov 128   ;;  %s3028_s27 = smov 8   ;;  %v2097_v15 = vpop.permute.xlu1 %2096  ;;  %v2095_v31 = vpop.permute.xlu0 %2094 }
 0xbdc   :  { %2329 = dma.vmem_to_hbm [thread:$0]  %s2324_s20, 256, %s3501_s8, [#allocation5], %s3027_s26, %s3027_s26, %s3028_s27   ;;  %v2184_v32 = vadd.f32 %v2699_v7, %v2097_v15  ;;  %v2179_v33 = vadd.f32 %v2178_v8, %v2095_v31 }
 0xbdd   :  { %s3029_s8 = smov [#allocation2]  }
 0xbde   :  { %v2421_v34 = vmul.f32 -1.442695, %v2184_v32  ;;  %v2420_v35 = vmul.f32 -1.442695, %v2179_v33  ;;  %s2311_s10 = sshll.u32 %s3029_s8, 4  ;;  %s2312_s10 = int_to_ptr.vmem [resolvable:$true] %s2311_s10 }
 0xbdf   :  { %v2216_v28 = vpop.permute.xlu1 %2215  ;;  %v2214_v40 = vpop.permute.xlu0 %2213  ;;  %s2991_s11 = scalar_lea.vmem %s2312_s10, 256  ;;  %p2996_p9 = scmp.lt.s32.totalorder %s2312_s10, %s2312_s10 }
 0xbe0   :  { %2957 = vpow2.f32 %v2421_v34  ;;  %p2992_p8 = scmp.ne.s32.totalorder %s2312_s10, %s2991_s11  ;;  %p2997_p10 = scmp.lt.s32.totalorder %s2991_s11, %s2991_s11 }
 0xbe1   :  { %2959 = vpow2.f32 %v2420_v35 }
 0xbe2   :  { %p2998_p11 = por %p2997_p10, %p2996_p9 }
 0xbe4   :  { %p2999_p12 = pnand %p2998_p11, %p2992_p8 }
 0xbea   :  { %v2958_v36 = vpop.eup %2957 }
 0xbeb   :  { %v2960_v41 = vpop.eup %2959  ;;  %v2202_v27 = vadd.f32 1.0, %v2958_v36 }
 0xbec   :  { %v2201_v30 = vadd.f32 1.0, %v2960_v41 }
 0xbed   :  { %2961 = vrcp.f32 %v2202_v27 }
 0xbee   :  { %2963 = vrcp.f32 %v2201_v30 }
 0xbf7   :  { %v2962_v45 = vpop.eup %2961 }
 0xbf8   :  { %v2964_v46 = vpop.eup %2963  ;;  %v2299_v47 = vsub.f32 1.0, %v2962_v45  ;;  %v2297_v51 = vmul.f32 %v2962_v45, %v3443_v60 }
 0xbf9   :  { %v2298_v49 = vsub.f32 1.0, %v2964_v46  ;;  %v2296_v17 = vmul.f32 %v2964_v46, %v3445_v61 }
 0xca6   :  { %v2706_v42 = vpop.f32.mrb[26].mxu1 }
 0xca7   :  { %v2291_v29 = vadd.f32 %v2706_v42, %v2216_v28  ;;  %v2285_v43 = vpop.f32.mrb[27].mxu1 }
 0xca8   :  { %v2286_v44 = vadd.f32 %v2285_v43, %v2214_v40 }
 0xca9   :  { %2965 = vtanh.f32 %v2291_v29 }
 0xcaa   :  { %2967 = vtanh.f32 %v2286_v44 }
 0xcb3   :  { %v2966_v48 = vpop.eup %2965 }
 0xcb4   :  { %v2968_v50 = vpop.eup %2967  ;;  %v2301_v52 = vmul.f32 %v2966_v48, %v2299_v47 }
 0xcb5   :  { %v2300_v18 = vmul.f32 %v2968_v50, %v2298_v49 }
 0xcb6   :  { %v2303_v14 = vadd.f32 %v2301_v52, %v2297_v51 }
 0xcb7   :  { %v2302_v16 = vadd.f32 %v2300_v18, %v2296_v17 }
 0xcb8   :  { %2305 = vst.msk [vmem:[#allocation2 + $0x8] sm:$0xff] %vm1441_vm3, %v2303_v14 }
 0xcb9   :  { %2304 = vst.msk [vmem:[#allocation2] sm:$0xff] %vm1441_vm3, %v2302_v16 }
 0xcba   :  { %3002 = shalt.err (!%p2999_p12)
}
 0xcbb   :  { %s3003_s14 = scalar_lea.hbm %s3500_s7, 256 }
 0xcbc   :  { %p3004_p13 = scmp.ne.s32.totalorder %s3500_s7, %s3003_s14  ;;  %p3007_p0 = scmp.lt.u32.totalorder %s3003_s14, %s3500_s7 }
 0xcbe   :  { %p3009_p1 = pnand %p3007_p0, %p3004_p13 }
 0xcc0   :  { %3012 = shalt.err (!%p3009_p1)
}
 0xcc1   :  { %2317 = dma.vmem_to_hbm [thread:$0]  %s2312_s10, 256, %s3500_s7, [#allocation3], %s3027_s26, %s3027_s26, %s3028_s27  }
 0xcc2   :  { %3013 = dma.done.wait [#allocation3], 256  }
 0xcc3   :  { %3014 = vsyncadd [#allocation3], 4294967040 }
 0xcc4   :  { %3015 = dma.done.wait [#allocation5], 256  }
 0xcc5   :  { %3016 = vsyncadd [#allocation5], 4294967040 }
 0xcc6   :  { %2336 = vsyncpa [#allocation3], 1 }
 0xcc7   :  { %2337 = vsyncpa [#allocation5], 1 }

</bundles_post_ra>
